<compile_context>
chip_gen: v7x
topology: tpu7x:2x2x1
jax: 0.10.0
libtpu: 0.0.40
codegen_flags: <defaults>
</compile_context>

<pallas_src>
import jax
import jax.numpy as jnp
from jax.experimental import pallas as pl
from jax.experimental.pallas import tpu as pltpu

# ----- hyper-parameters: Embedding(d_in=4, d_out=32, stride=2, n=4) -----
D_IN = 4
D_OUT = 32
STRIDE = 2
N_BRANCH = 4
D_HIDDEN = D_OUT // N_BRANCH                                      # 8
KSIZES = tuple(2 * i + 2 * STRIDE - 1 for i in range(N_BRANCH))   # (3, 5, 7, 9)
PADS = tuple(STRIDE + i - 1 for i in range(N_BRANCH))             # (1, 2, 3, 4)
K_TOTAL = sum(KSIZES)                                             # 24
K_OFFS = tuple(sum(KSIZES[:i]) for i in range(N_BRANCH))          # (0, 3, 8, 15)
P_MAX = max(PADS)                                                 # 4
HALO = P_MAX // STRIDE                                            # 2 zero columns per phase
BN_EPS = 1e-5
_INV_SQRT2 = 0.7071067811865476


# ============ kernel A: 1x1 conv + n strided depthwise branches + concat + partial stats ============
def _conv_branches_kernel(x2_ref, w1_ref, b1_ref, wd_ref, y_ref, st_ref, hp_ref):
    """One batch element per grid step, channels-first (C on sublanes, L on lanes).

    x2_ref : (1, 2*d_in, Lh)      rows 0:4 = x[:, 0::2] (even phase), rows 4:8 = x[:, 1::2]
    w1_ref : (d_hidden, d_in)     conv1 weight (PyTorch orientation, k squeezed)
    b1_ref : (d_hidden, 1)        conv1 bias
    wd_ref : (d_hidden, K_TOTAL)  packed depthwise taps, branch i at cols K_OFFS[i]:,
                                  already pre-scaled by softmax(mix_w)[i]
    y_ref  : (1, d_out, L_out)    weighted / concatenated signals (pre-BN)
    st_ref : (1, d_out, 2)        per-batch-element (sum, sum_sq) over L_out, per channel
    hp_ref : (2*d_hidden, Lh+2*HALO) scratch: zero-haloed even/odd phases of h
    """
    Lh = x2_ref.shape[2]
    L_out = y_ref.shape[2]

    w1 = w1_ref[...]                                    # (8, 4)
    b1 = b1_ref[...]                                    # (8, 1)
    xe = x2_ref[0, 0:D_IN, :]                           # (4, Lh)  even-phase input
    xo = x2_ref[0, D_IN:2 * D_IN, :]                    # (4, Lh)  odd-phase input

    # --- 1x1 conv as broadcast FMAs on the VPU (no MXU for a 4x8 matmul) ---
    h_even = jnp.broadcast_to(b1, (D_HIDDEN, Lh))
    h_odd = jnp.broadcast_to(b1, (D_HIDDEN, Lh))
    for ci in range(D_IN):                              # statically unrolled
        h_even = h_even + w1[:, ci:ci + 1] * xe[ci:ci + 1, :]
        h_odd = h_odd + w1[:, ci:ci + 1] * xo[ci:ci + 1, :]

    # --- zero only the 2-column halos, then drop both phases of h into the scratch ---
    zhalo = jnp.zeros((2 * D_HIDDEN, HALO), jnp.float32)
    hp_ref[:, 0:HALO] = zhalo
    hp_ref[:, HALO + Lh:HALO + Lh + HALO] = zhalo
    hp_ref[0:D_HIDDEN, HALO:HALO + Lh] = h_even
    hp_ref[D_HIDDEN:2 * D_HIDDEN, HALO:HALO + Lh] = h_odd

    # --- each depthwise tap = contiguous lane slice of the right phase + per-channel FMA ---
    wd = wd_ref[...]                                    # (8, 24), softmax-scaled taps
    branch_sigs = []
    for i in range(N_BRANCH):
        K, P = KSIZES[i], PADS[i]
        acc = jnp.zeros((D_HIDDEN, L_out), jnp.float32)
        for k in range(K):                              # statically unrolled taps
            off = k - P + P_MAX                         # static, in [0, 8]
            phase, m = off % 2, off // 2                # phase (even/odd) and lane offset
            rows = hp_ref[phase * D_HIDDEN:(phase + 1) * D_HIDDEN, m:m + L_out]
            acc = acc + wd[:, K_OFFS[i] + k:K_OFFS[i] + k + 1] * rows
        branch_sigs.append(acc)

    # --- single lane-dense store of the concatenated (d_out, L_out) tile (torch.cat order) ---
    y = jnp.concatenate(branch_sigs, axis=0)            # (32, L_out)
    y_ref[0] = y

    # --- single-pass per-channel partial stats for the BN pass (sum and sum of squares) ---
    st_ref[0, :, 0:1] = jnp.sum(y, axis=1, keepdims=True)
    st_ref[0, :, 1:2] = jnp.sum(y * y, axis=1, keepdims=True)


# ============ kernel B: folded BatchNorm affine + exact-erf GELU ============
def _erf_approx(x):
    # Abramowitz & Stegun 7.1.26, |err| < 1.5e-7. Reproduces nn.GELU()'s exact-erf GELU
    # using only exp (EUP) / abs / where / FMA.
    p = 0.3275911
    a1, a2, a3, a4, a5 = 0.254829592, -0.284496736, 1.421413741, -1.453152027, 1.061405429
    sgn = jnp.where(x < 0.0, -1.0, 1.0)
    ax = jnp.abs(x)
    t = 1.0 / (1.0 + p * ax)
    poly = ((((a5 * t + a4) * t + a3) * t + a2) * t + a1) * t
    return sgn * (1.0 - poly * jnp.exp(-ax * ax))


def _bn_gelu_kernel(y_ref, scale_ref, shift_ref, out_ref):
    """Apply the per-channel affine folded from the batch statistics + gamma/beta,
    then exact-erf GELU. Channels-first: (d_out, Lt) tile, scale/shift are (d_out, 1)."""
    z = y_ref[0] * scale_ref[...] + shift_ref[...]
    out_ref[0] = 0.5 * z * (1.0 + _erf_approx(z * _INV_SQRT2))


# ============ wrapper ============
def embedding_forward(x_ncl, params):
    """x_ncl: (B, d_in, L) float32 (PyTorch NCL). Returns (B, d_out, L_out) NCL."""
    B, d_in, L = x_ncl.shape
    assert d_in == D_IN
    # TODO(synk): odd L needs a masked tail column in the even/odd split; even L only here.
    assert L % STRIDE == 0
    Lh = L // STRIDE
    L_out = (L - 1) // STRIDE + 1                       # == Lh for even L
    x = x_ncl.astype(jnp.float32)

    # Layout plumbing (wrapper side): split the sequence once into its stride-2 phases so
    # every in-kernel depthwise tap is a contiguous lane slice (no strided gathers).
    xr = x.reshape(B, D_IN, Lh, STRIDE)
    x2 = jnp.concatenate([xr[..., 0], xr[..., 1]], axis=1)          # (B, 2*d_in, Lh)

    # Fold softmax(mix_w) into the depthwise taps once; pack all branches into one tile.
    nw = jax.nn.softmax(params["mix_w"])                            # (n,)
    wd_all = jnp.concatenate(
        [params["wd"][i] * nw[i] for i in range(N_BRANCH)], axis=1)  # (8, 24)

    conv_call = pl.pallas_call(
        _conv_branches_kernel,
        out_shape=(jax.ShapeDtypeStruct((B, D_OUT, L_out), jnp.float32),
                   jax.ShapeDtypeStruct((B, D_OUT, 2), jnp.float32)),
        grid_spec=pltpu.PrefetchScalarGridSpec(
            num_scalar_prefetch=0,
            grid=(B,),
            in_specs=[
                pl.BlockSpec((1, 2 * D_IN, Lh), lambda b: (b, 0, 0)),
                pl.BlockSpec((D_HIDDEN, D_IN), lambda b: (0, 0)),
                pl.BlockSpec((D_HIDDEN, 1), lambda b: (0, 0)),
                pl.BlockSpec((D_HIDDEN, K_TOTAL), lambda b: (0, 0)),
            ],
            out_specs=[
                pl.BlockSpec((1, D_OUT, L_out), lambda b: (b, 0, 0)),
                pl.BlockSpec((1, D_OUT, 2), lambda b: (b, 0, 0)),
            ],
            scratch_shapes=[pltpu.VMEM((2 * D_HIDDEN, Lh + 2 * HALO), jnp.float32)],
        ),
        compiler_params=pltpu.CompilerParams(dimension_semantics=("parallel",)),
    )
    y, stats = conv_call(x2, params["w1"], params["b1"].reshape(D_HIDDEN, 1), wd_all)

    # Combine the tiny per-batch partial sums and fold BN (training-mode, biased variance)
    # together with gamma/beta into a single per-channel affine (32-element glue math).
    count = float(B * L_out)
    s = jnp.sum(stats[:, :, 0], axis=0)
    sq = jnp.sum(stats[:, :, 1], axis=0)
    mean = s / count
    var = sq / count - mean * mean                      # biased variance (torch BN training)
    # TODO(synk): for very large B*L switch to a shifted/two-pass variance to avoid cancellation.
    inv_std = jax.lax.rsqrt(var + BN_EPS)
    scale = (params["gamma"] * inv_std).reshape(D_OUT, 1)
    shift = (params["beta"] - params["gamma"] * inv_std * mean).reshape(D_OUT, 1)

    # Normalize + GELU, tiled over (batch, L_out); never maps the whole array as one block.
    LT = min(L_out, 512)
    if L_out % LT:
        LT = L_out
    bn_call = pl.pallas_call(
        _bn_gelu_kernel,
        out_shape=jax.ShapeDtypeStruct((B, D_OUT, L_out), jnp.float32),
        grid_spec=pltpu.PrefetchScalarGridSpec(
            num_scalar_prefetch=0,
            grid=(B, L_out // LT),
            in_specs=[
                pl.BlockSpec((1, D_OUT, LT), lambda b, l: (b, 0, l)),
                pl.BlockSpec((D_OUT, 1), lambda b, l: (0, 0)),
                pl.BlockSpec((D_OUT, 1), lambda b, l: (0, 0)),
            ],
            out_specs=pl.BlockSpec((1, D_OUT, LT), lambda b, l: (b, 0, l)),
        ),
        compiler_params=pltpu.CompilerParams(
            dimension_semantics=("parallel", "parallel")),
    )
    return bn_call(y, scale, shift)                     # already PyTorch NCL; no transpose


# ============ deterministic parameter init (shapes from Embedding.__init__) ============
def init_params(key):
    keys = jax.random.split(key, 5 + N_BRANCH)
    fan1 = 1.0 / (D_IN ** 0.5)
    return {
        "w1": jax.random.uniform(keys[0], (D_HIDDEN, D_IN), jnp.float32, -fan1, fan1),
        "b1": jax.random.uniform(keys[1], (D_HIDDEN,), jnp.float32, -fan1, fan1),
        "wd": [jax.random.uniform(keys[2 + i], (D_HIDDEN, KSIZES[i]), jnp.float32,
                                  -1.0 / (KSIZES[i] ** 0.5), 1.0 / (KSIZES[i] ** 0.5))
               for i in range(N_BRANCH)],
        # nn.Parameter(torch.ones(n)) in the module; random logits exercise the softmax path.
        "mix_w": jax.random.normal(keys[2 + N_BRANCH], (N_BRANCH,), jnp.float32),
        "gamma": 1.0 + 0.1 * jax.random.normal(keys[3 + N_BRANCH], (D_OUT,), jnp.float32),
        "beta": 0.1 * jax.random.normal(keys[4 + N_BRANCH], (D_OUT,), jnp.float32),
    }


# ============ pure-JAX (XLA) reference for the correctness check ============
def reference_forward(x_ncl, params):
    x = x_ncl.astype(jnp.float32)                                   # (B, d_in, L)
    w1 = params["w1"][:, :, None]                                   # (dh, d_in, 1) OIH
    h = jax.lax.conv_general_dilated(
        x, w1, window_strides=(1,), padding=[(0, 0)],
        dimension_numbers=("NCH", "OIH", "NCH"),
        precision=jax.lax.Precision.HIGHEST)
    h = h + params["b1"][None, :, None]
    nw = jax.nn.softmax(params["mix_w"])
    sigs = []
    for i in range(N_BRANCH):
        wd = params["wd"][i][:, None, :]                            # (dh, 1, K) depthwise
        s = jax.lax.conv_general_dilated(
            h, wd, window_strides=(STRIDE,), padding=[(PADS[i], PADS[i])],
            dimension_numbers=("NCH", "OIH", "NCH"),
            feature_group_count=D_HIDDEN,
            precision=jax.lax.Precision.HIGHEST)
        sigs.append(nw[i] * s)
    y = jnp.concatenate(sigs, axis=1)                               # (B, d_out, L_out)
    mean = jnp.mean(y, axis=(0, 2), keepdims=True)
    var = jnp.mean((y - mean) ** 2, axis=(0, 2), keepdims=True)
    z = (y - mean) * jax.lax.rsqrt(var + BN_EPS)
    z = z * params["gamma"][None, :, None] + params["beta"][None, :, None]
    return jax.nn.gelu(z, approximate=False)


if __name__ == "__main__":
    root = jax.random.PRNGKey(0)
    pkey, xkey = jax.random.split(root)
    params = init_params(pkey)

    B, L = 2, 16
    x = jax.random.normal(xkey, (B, D_IN, L), jnp.float32)          # PyTorch NCL input

    out = jax.jit(embedding_forward)(x, params)
    out = jax.block_until_ready(out)

    ref = reference_forward(x, params)
    max_err = float(jnp.max(jnp.abs(out - ref)))
    assert out.shape == (B, D_OUT, (L - 1) // STRIDE + 1), out.shape
    assert max_err < 1e-2, f"mismatch vs reference: max abs err = {max_err}"
    print("KERNEL_OK")
</pallas_src>

<mosaic_0001>
module attributes {stable_mosaic.version = 11 : i64} {
  func.func @_conv_branches_kernel(%arg0: i32, %arg1: memref<1x8x8xf32, #tpu.memory_space<vmem>>, %arg2: memref<8x4xf32, #tpu.memory_space<vmem>>, %arg3: memref<8x1xf32, #tpu.memory_space<vmem>>, %arg4: memref<8x24xf32, #tpu.memory_space<vmem>>, %arg5: memref<1x32x8xf32, #tpu.memory_space<vmem>>, %arg6: memref<1x32x2xf32, #tpu.memory_space<vmem>>, %arg7: memref<16x12xf32, #tpu.memory_space<vmem>>) attributes {dimension_semantics = [#tpu.dimension_semantics<parallel>], iteration_bounds = array<i64: 2>, scalar_prefetch = 0 : i64, scratch_operands = 1 : i64, tpu.core_type = #tpu.core_type<tc>, window_params = [{transform_indices = @transform_0, window_bounds = array<i64: 1, 8, 8>}, {pipeline_mode = #tpu.pipeline_mode<synchronous>, transform_indices = @transform_1, window_bounds = array<i64: 8, 4>}, {pipeline_mode = #tpu.pipeline_mode<synchronous>, transform_indices = @transform_2, window_bounds = array<i64: 8, 1>}, {pipeline_mode = #tpu.pipeline_mode<synchronous>, transform_indices = @transform_3, window_bounds = array<i64: 8, 24>}, {transform_indices = @transform_4, window_bounds = array<i64: 1, 32, 8>}, {transform_indices = @transform_5, window_bounds = array<i64: 1, 32, 2>}]} {
    %c0 = arith.constant 0 : index
    %c0_0 = arith.constant 0 : index
    %0 = vector.load %arg2[%c0, %c0_0] : memref<8x4xf32, #tpu.memory_space<vmem>>, vector<8x4xf32>
    %c0_1 = arith.constant 0 : index
    %c0_2 = arith.constant 0 : index
    %1 = vector.load %arg3[%c0_1, %c0_2] : memref<8x1xf32, #tpu.memory_space<vmem>>, vector<8x1xf32>
    %c0_3 = arith.constant 0 : index
    %c0_4 = arith.constant 0 : index
    %c0_5 = arith.constant 0 : index
    %2 = vector.load %arg1[%c0_3, %c0_4, %c0_5] : memref<1x8x8xf32, #tpu.memory_space<vmem>>, vector<1x4x8xf32>
    %3 = vector.shape_cast %2 : vector<1x4x8xf32> to vector<4x8xf32>
    %c0_6 = arith.constant 0 : index
    %c4 = arith.constant 4 : index
    %c0_7 = arith.constant 0 : index
    %4 = vector.load %arg1[%c0_6, %c4, %c0_7] : memref<1x8x8xf32, #tpu.memory_space<vmem>>, vector<1x4x8xf32>
    %5 = vector.shape_cast %4 : vector<1x4x8xf32> to vector<4x8xf32>
    %6 = vector.shape_cast %1 : vector<8x1xf32> to vector<8x1xf32>
    %7 = vector.broadcast %6 : vector<8x1xf32> to vector<8x8xf32>
    %8 = vector.shape_cast %1 : vector<8x1xf32> to vector<8x1xf32>
    %9 = vector.broadcast %8 : vector<8x1xf32> to vector<8x8xf32>
    %10 = vector.extract_strided_slice %0 {offsets = [0, 0], sizes = [8, 1], strides = [1, 1]} : vector<8x4xf32> to vector<8x1xf32>
    %11 = vector.extract_strided_slice %3 {offsets = [0, 0], sizes = [1, 8], strides = [1, 1]} : vector<4x8xf32> to vector<1x8xf32>
    %12 = vector.broadcast %10 : vector<8x1xf32> to vector<8x8xf32>
    %13 = vector.broadcast %11 : vector<1x8xf32> to vector<8x8xf32>
    %14 = arith.mulf %12, %13 : vector<8x8xf32>
    %15 = arith.addf %7, %14 : vector<8x8xf32>
    %16 = vector.extract_strided_slice %0 {offsets = [0, 0], sizes = [8, 1], strides = [1, 1]} : vector<8x4xf32> to vector<8x1xf32>
    %17 = vector.extract_strided_slice %5 {offsets = [0, 0], sizes = [1, 8], strides = [1, 1]} : vector<4x8xf32> to vector<1x8xf32>
    %18 = vector.broadcast %16 : vector<8x1xf32> to vector<8x8xf32>
    %19 = vector.broadcast %17 : vector<1x8xf32> to vector<8x8xf32>
    %20 = arith.mulf %18, %19 : vector<8x8xf32>
    %21 = arith.addf %9, %20 : vector<8x8xf32>
    %22 = vector.extract_strided_slice %0 {offsets = [0, 1], sizes = [8, 1], strides = [1, 1]} : vector<8x4xf32> to vector<8x1xf32>
    %23 = vector.extract_strided_slice %3 {offsets = [1, 0], sizes = [1, 8], strides = [1, 1]} : vector<4x8xf32> to vector<1x8xf32>
    %24 = vector.broadcast %22 : vector<8x1xf32> to vector<8x8xf32>
    %25 = vector.broadcast %23 : vector<1x8xf32> to vector<8x8xf32>
    %26 = arith.mulf %24, %25 : vector<8x8xf32>
    %27 = arith.addf %15, %26 : vector<8x8xf32>
    %28 = vector.extract_strided_slice %0 {offsets = [0, 1], sizes = [8, 1], strides = [1, 1]} : vector<8x4xf32> to vector<8x1xf32>
    %29 = vector.extract_strided_slice %5 {offsets = [1, 0], sizes = [1, 8], strides = [1, 1]} : vector<4x8xf32> to vector<1x8xf32>
    %30 = vector.broadcast %28 : vector<8x1xf32> to vector<8x8xf32>
    %31 = vector.broadcast %29 : vector<1x8xf32> to vector<8x8xf32>
    %32 = arith.mulf %30, %31 : vector<8x8xf32>
    %33 = arith.addf %21, %32 : vector<8x8xf32>
    %34 = vector.extract_strided_slice %0 {offsets = [0, 2], sizes = [8, 1], strides = [1, 1]} : vector<8x4xf32> to vector<8x1xf32>
    %35 = vector.extract_strided_slice %3 {offsets = [2, 0], sizes = [1, 8], strides = [1, 1]} : vector<4x8xf32> to vector<1x8xf32>
    %36 = vector.broadcast %34 : vector<8x1xf32> to vector<8x8xf32>
    %37 = vector.broadcast %35 : vector<1x8xf32> to vector<8x8xf32>
    %38 = arith.mulf %36, %37 : vector<8x8xf32>
    %39 = arith.addf %27, %38 : vector<8x8xf32>
    %40 = vector.extract_strided_slice %0 {offsets = [0, 2], sizes = [8, 1], strides = [1, 1]} : vector<8x4xf32> to vector<8x1xf32>
    %41 = vector.extract_strided_slice %5 {offsets = [2, 0], sizes = [1, 8], strides = [1, 1]} : vector<4x8xf32> to vector<1x8xf32>
    %42 = vector.broadcast %40 : vector<8x1xf32> to vector<8x8xf32>
    %43 = vector.broadcast %41 : vector<1x8xf32> to vector<8x8xf32>
    %44 = arith.mulf %42, %43 : vector<8x8xf32>
    %45 = arith.addf %33, %44 : vector<8x8xf32>
    %46 = vector.extract_strided_slice %0 {offsets = [0, 3], sizes = [8, 1], strides = [1, 1]} : vector<8x4xf32> to vector<8x1xf32>
    %47 = vector.extract_strided_slice %3 {offsets = [3, 0], sizes = [1, 8], strides = [1, 1]} : vector<4x8xf32> to vector<1x8xf32>
    %48 = vector.broadcast %46 : vector<8x1xf32> to vector<8x8xf32>
    %49 = vector.broadcast %47 : vector<1x8xf32> to vector<8x8xf32>
    %50 = arith.mulf %48, %49 : vector<8x8xf32>
    %51 = arith.addf %39, %50 : vector<8x8xf32>
    %52 = vector.extract_strided_slice %0 {offsets = [0, 3], sizes = [8, 1], strides = [1, 1]} : vector<8x4xf32> to vector<8x1xf32>
    %53 = vector.extract_strided_slice %5 {offsets = [3, 0], sizes = [1, 8], strides = [1, 1]} : vector<4x8xf32> to vector<1x8xf32>
    %54 = vector.broadcast %52 : vector<8x1xf32> to vector<8x8xf32>
    %55 = vector.broadcast %53 : vector<1x8xf32> to vector<8x8xf32>
    %56 = arith.mulf %54, %55 : vector<8x8xf32>
    %57 = arith.addf %45, %56 : vector<8x8xf32>
    %cst = arith.constant 0.000000e+00 : f32
    %58 = vector.broadcast %cst : f32 to vector<16x2xf32>
    %c0_8 = arith.constant 0 : index
    %c0_9 = arith.constant 0 : index
    %59 = vector.load %arg7[%c0_8, %c0_9] : memref<16x12xf32, #tpu.memory_space<vmem>>, vector<16x2xf32>
    tpu.vector_store %arg7[%c0_8, %c0_9], %58 {strides = array<i32>} : memref<16x12xf32, #tpu.memory_space<vmem>>, vector<16x2xf32>,
    %c0_10 = arith.constant 0 : index
    %c10 = arith.constant 10 : index
    %60 = vector.load %arg7[%c0_10, %c10] : memref<16x12xf32, #tpu.memory_space<vmem>>, vector<16x2xf32>
    tpu.vector_store %arg7[%c0_10, %c10], %58 {strides = array<i32>} : memref<16x12xf32, #tpu.memory_space<vmem>>, vector<16x2xf32>,
    %c0_11 = arith.constant 0 : index
    %c2 = arith.constant 2 : index
    %61 = vector.load %arg7[%c0_11, %c2] : memref<16x12xf32, #tpu.memory_space<vmem>>, vector<8x8xf32>
    tpu.vector_store %arg7[%c0_11, %c2], %51 {strides = array<i32>} : memref<16x12xf32, #tpu.memory_space<vmem>>, vector<8x8xf32>,
    %c8 = arith.constant 8 : index
    %c2_12 = arith.constant 2 : index
    %62 = vector.load %arg7[%c8, %c2_12] : memref<16x12xf32, #tpu.memory_space<vmem>>, vector<8x8xf32>
    tpu.vector_store %arg7[%c8, %c2_12], %57 {strides = array<i32>} : memref<16x12xf32, #tpu.memory_space<vmem>>, vector<8x8xf32>,
    %c0_13 = arith.constant 0 : index
    %c0_14 = arith.constant 0 : index
    %63 = vector.load %arg4[%c0_13, %c0_14] : memref<8x24xf32, #tpu.memory_space<vmem>>, vector<8x24xf32>
    %cst_15 = arith.constant 0.000000e+00 : f32
    %64 = vector.broadcast %cst_15 : f32 to vector<8x8xf32>
    %c8_16 = arith.constant 8 : index
    %c1 = arith.constant 1 : index
    %65 = vector.load %arg7[%c8_16, %c1] : memref<16x12xf32, #tpu.memory_space<vmem>>, vector<8x8xf32>
    %66 = vector.extract_strided_slice %63 {offsets = [0, 0], sizes = [8, 1], strides = [1, 1]} : vector<8x24xf32> to vector<8x1xf32>
    %67 = vector.broadcast %66 : vector<8x1xf32> to vector<8x8xf32>
    %68 = arith.mulf %67, %65 : vector<8x8xf32>
    %69 = arith.addf %64, %68 : vector<8x8xf32>
    %c0_17 = arith.constant 0 : index
    %c2_18 = arith.constant 2 : index
    %70 = vector.load %arg7[%c0_17, %c2_18] : memref<16x12xf32, #tpu.memory_space<vmem>>, vector<8x8xf32>
    %71 = vector.extract_strided_slice %63 {offsets = [0, 1], sizes = [8, 1], strides = [1, 1]} : vector<8x24xf32> to vector<8x1xf32>
    %72 = vector.broadcast %71 : vector<8x1xf32> to vector<8x8xf32>
    %73 = arith.mulf %72, %70 : vector<8x8xf32>
    %74 = arith.addf %69, %73 : vector<8x8xf32>
    %c8_19 = arith.constant 8 : index
    %c2_20 = arith.constant 2 : index
    %75 = vector.load %arg7[%c8_19, %c2_20] : memref<16x12xf32, #tpu.memory_space<vmem>>, vector<8x8xf32>
    %76 = vector.extract_strided_slice %63 {offsets = [0, 2], sizes = [8, 1], strides = [1, 1]} : vector<8x24xf32> to vector<8x1xf32>
    %77 = vector.broadcast %76 : vector<8x1xf32> to vector<8x8xf32>
    %78 = arith.mulf %77, %75 : vector<8x8xf32>
    %79 = arith.addf %74, %78 : vector<8x8xf32>
    %cst_21 = arith.constant 0.000000e+00 : f32
    %80 = vector.broadcast %cst_21 : f32 to vector<8x8xf32>
    %c0_22 = arith.constant 0 : index
    %c1_23 = arith.constant 1 : index
    %81 = vector.load %arg7[%c0_22, %c1_23] : memref<16x12xf32, #tpu.memory_space<vmem>>, vector<8x8xf32>
    %82 = vector.extract_strided_slice %63 {offsets = [0, 3], sizes = [8, 1], strides = [1, 1]} : vector<8x24xf32> to vector<8x1xf32>
    %83 = vector.broadcast %82 : vector<8x1xf32> to vector<8x8xf32>
    %84 = arith.mulf %83, %81 : vector<8x8xf32>
    %85 = arith.addf %80, %84 : vector<8x8xf32>
    %c8_24 = arith.constant 8 : index
    %c1_25 = arith.constant 1 : index
    %86 = vector.load %arg7[%c8_24, %c1_25] : memref<16x12xf32, #tpu.memory_space<vmem>>, vector<8x8xf32>
    %87 = vector.extract_strided_slice %63 {offsets = [0, 4], sizes = [8, 1], strides = [1, 1]} : vector<8x24xf32> to vector<8x1xf32>
    %88 = vector.broadcast %87 : vector<8x1xf32> to vector<8x8xf32>
    %89 = arith.mulf %88, %86 : vector<8x8xf32>
    %90 = arith.addf %85, %89 : vector<8x8xf32>
    %c0_26 = arith.constant 0 : index
    %c2_27 = arith.constant 2 : index
    %91 = vector.load %arg7[%c0_26, %c2_27] : memref<16x12xf32, #tpu.memory_space<vmem>>, vector<8x8xf32>
    %92 = vector.extract_strided_slice %63 {offsets = [0, 5], sizes = [8, 1], strides = [1, 1]} : vector<8x24xf32> to vector<8x1xf32>
    %93 = vector.broadcast %92 : vector<8x1xf32> to vector<8x8xf32>
    %94 = arith.mulf %93, %91 : vector<8x8xf32>
    %95 = arith.addf %90, %94 : vector<8x8xf32>
    %c8_28 = arith.constant 8 : index
    %c2_29 = arith.constant 2 : index
    %96 = vector.load %arg7[%c8_28, %c2_29] : memref<16x12xf32, #tpu.memory_space<vmem>>, vector<8x8xf32>
    %97 = vector.extract_strided_slice %63 {offsets = [0, 6], sizes = [8, 1], strides = [1, 1]} : vector<8x24xf32> to vector<8x1xf32>
    %98 = vector.broadcast %97 : vector<8x1xf32> to vector<8x8xf32>
    %99 = arith.mulf %98, %96 : vector<8x8xf32>
    %100 = arith.addf %95, %99 : vector<8x8xf32>
    %c0_30 = arith.constant 0 : index
    %c3 = arith.constant 3 : index
    %101 = vector.load %arg7[%c0_30, %c3] : memref<16x12xf32, #tpu.memory_space<vmem>>, vector<8x8xf32>
    %102 = vector.extract_strided_slice %63 {offsets = [0, 7], sizes = [8, 1], strides = [1, 1]} : vector<8x24xf32> to vector<8x1xf32>
    %103 = vector.broadcast %102 : vector<8x1xf32> to vector<8x8xf32>
    %104 = arith.mulf %103, %101 : vector<8x8xf32>
    %105 = arith.addf %100, %104 : vector<8x8xf32>
    %cst_31 = arith.constant 0.000000e+00 : f32
    %106 = vector.broadcast %cst_31 : f32 to vector<8x8xf32>
    %c8_32 = arith.constant 8 : index
    %c0_33 = arith.constant 0 : index
    %107 = vector.load %arg7[%c8_32, %c0_33] : memref<16x12xf32, #tpu.memory_space<vmem>>, vector<8x8xf32>
    %108 = vector.extract_strided_slice %63 {offsets = [0, 8], sizes = [8, 1], strides = [1, 1]} : vector<8x24xf32> to vector<8x1xf32>
    %109 = vector.broadcast %108 : vector<8x1xf32> to vector<8x8xf32>
    %110 = arith.mulf %109, %107 : vector<8x8xf32>
    %111 = arith.addf %106, %110 : vector<8x8xf32>
    %c0_34 = arith.constant 0 : index
    %c1_35 = arith.constant 1 : index
    %112 = vector.load %arg7[%c0_34, %c1_35] : memref<16x12xf32, #tpu.memory_space<vmem>>, vector<8x8xf32>
    %113 = vector.extract_strided_slice %63 {offsets = [0, 9], sizes = [8, 1], strides = [1, 1]} : vector<8x24xf32> to vector<8x1xf32>
    %114 = vector.broadcast %113 : vector<8x1xf32> to vector<8x8xf32>
    %115 = arith.mulf %114, %112 : vector<8x8xf32>
    %116 = arith.addf %111, %115 : vector<8x8xf32>
    %c8_36 = arith.constant 8 : index
    %c1_37 = arith.constant 1 : index
    %117 = vector.load %arg7[%c8_36, %c1_37] : memref<16x12xf32, #tpu.memory_space<vmem>>, vector<8x8xf32>
    %118 = vector.extract_strided_slice %63 {offsets = [0, 10], sizes = [8, 1], strides = [1, 1]} : vector<8x24xf32> to vector<8x1xf32>
    %119 = vector.broadcast %118 : vector<8x1xf32> to vector<8x8xf32>
    %120 = arith.mulf %119, %117 : vector<8x8xf32>
    %121 = arith.addf %116, %120 : vector<8x8xf32>
    %c0_38 = arith.constant 0 : index
    %c2_39 = arith.constant 2 : index
    %122 = vector.load %arg7[%c0_38, %c2_39] : memref<16x12xf32, #tpu.memory_space<vmem>>, vector<8x8xf32>
    %123 = vector.extract_strided_slice %63 {offsets = [0, 11], sizes = [8, 1], strides = [1, 1]} : vector<8x24xf32> to vector<8x1xf32>
    %124 = vector.broadcast %123 : vector<8x1xf32> to vector<8x8xf32>
    %125 = arith.mulf %124, %122 : vector<8x8xf32>
    %126 = arith.addf %121, %125 : vector<8x8xf32>
    %c8_40 = arith.constant 8 : index
    %c2_41 = arith.constant 2 : index
    %127 = vector.load %arg7[%c8_40, %c2_41] : memref<16x12xf32, #tpu.memory_space<vmem>>, vector<8x8xf32>
    %128 = vector.extract_strided_slice %63 {offsets = [0, 12], sizes = [8, 1], strides = [1, 1]} : vector<8x24xf32> to vector<8x1xf32>
    %129 = vector.broadcast %128 : vector<8x1xf32> to vector<8x8xf32>
    %130 = arith.mulf %129, %127 : vector<8x8xf32>
    %131 = arith.addf %126, %130 : vector<8x8xf32>
    %c0_42 = arith.constant 0 : index
    %c3_43 = arith.constant 3 : index
    %132 = vector.load %arg7[%c0_42, %c3_43] : memref<16x12xf32, #tpu.memory_space<vmem>>, vector<8x8xf32>
    %133 = vector.extract_strided_slice %63 {offsets = [0, 13], sizes = [8, 1], strides = [1, 1]} : vector<8x24xf32> to vector<8x1xf32>
    %134 = vector.broadcast %133 : vector<8x1xf32> to vector<8x8xf32>
    %135 = arith.mulf %134, %132 : vector<8x8xf32>
    %136 = arith.addf %131, %135 : vector<8x8xf32>
    %c8_44 = arith.constant 8 : index
    %c3_45 = arith.constant 3 : index
    %137 = vector.load %arg7[%c8_44, %c3_45] : memref<16x12xf32, #tpu.memory_space<vmem>>, vector<8x8xf32>
    %138 = vector.extract_strided_slice %63 {offsets = [0, 14], sizes = [8, 1], strides = [1, 1]} : vector<8x24xf32> to vector<8x1xf32>
    %139 = vector.broadcast %138 : vector<8x1xf32> to vector<8x8xf32>
    %140 = arith.mulf %139, %137 : vector<8x8xf32>
    %141 = arith.addf %136, %140 : vector<8x8xf32>
    %cst_46 = arith.constant 0.000000e+00 : f32
    %142 = vector.broadcast %cst_46 : f32 to vector<8x8xf32>
    %c0_47 = arith.constant 0 : index
    %c0_48 = arith.constant 0 : index
    %143 = vector.load %arg7[%c0_47, %c0_48] : memref<16x12xf32, #tpu.memory_space<vmem>>, vector<8x8xf32>
    %144 = vector.extract_strided_slice %63 {offsets = [0, 15], sizes = [8, 1], strides = [1, 1]} : vector<8x24xf32> to vector<8x1xf32>
    %145 = vector.broadcast %144 : vector<8x1xf32> to vector<8x8xf32>
    %146 = arith.mulf %145, %143 : vector<8x8xf32>
    %147 = arith.addf %142, %146 : vector<8x8xf32>
    %c8_49 = arith.constant 8 : index
    %c0_50 = arith.constant 0 : index
    %148 = vector.load %arg7[%c8_49, %c0_50] : memref<16x12xf32, #tpu.memory_space<vmem>>, vector<8x8xf32>
    %149 = vector.extract_strided_slice %63 {offsets = [0, 16], sizes = [8, 1], strides = [1, 1]} : vector<8x24xf32> to vector<8x1xf32>
    %150 = vector.broadcast %149 : vector<8x1xf32> to vector<8x8xf32>
    %151 = arith.mulf %150, %148 : vector<8x8xf32>
    %152 = arith.addf %147, %151 : vector<8x8xf32>
    %c0_51 = arith.constant 0 : index
    %c1_52 = arith.constant 1 : index
    %153 = vector.load %arg7[%c0_51, %c1_52] : memref<16x12xf32, #tpu.memory_space<vmem>>, vector<8x8xf32>
    %154 = vector.extract_strided_slice %63 {offsets = [0, 17], sizes = [8, 1], strides = [1, 1]} : vector<8x24xf32> to vector<8x1xf32>
    %155 = vector.broadcast %154 : vector<8x1xf32> to vector<8x8xf32>
    %156 = arith.mulf %155, %153 : vector<8x8xf32>
    %157 = arith.addf %152, %156 : vector<8x8xf32>
    %c8_53 = arith.constant 8 : index
    %c1_54 = arith.constant 1 : index
    %158 = vector.load %arg7[%c8_53, %c1_54] : memref<16x12xf32, #tpu.memory_space<vmem>>, vector<8x8xf32>
    %159 = vector.extract_strided_slice %63 {offsets = [0, 18], sizes = [8, 1], strides = [1, 1]} : vector<8x24xf32> to vector<8x1xf32>
    %160 = vector.broadcast %159 : vector<8x1xf32> to vector<8x8xf32>
    %161 = arith.mulf %160, %158 : vector<8x8xf32>
    %162 = arith.addf %157, %161 : vector<8x8xf32>
    %c0_55 = arith.constant 0 : index
    %c2_56 = arith.constant 2 : index
    %163 = vector.load %arg7[%c0_55, %c2_56] : memref<16x12xf32, #tpu.memory_space<vmem>>, vector<8x8xf32>
    %164 = vector.extract_strided_slice %63 {offsets = [0, 19], sizes = [8, 1], strides = [1, 1]} : vector<8x24xf32> to vector<8x1xf32>
    %165 = vector.broadcast %164 : vector<8x1xf32> to vector<8x8xf32>
    %166 = arith.mulf %165, %163 : vector<8x8xf32>
    %167 = arith.addf %162, %166 : vector<8x8xf32>
    %c8_57 = arith.constant 8 : index
    %c2_58 = arith.constant 2 : index
    %168 = vector.load %arg7[%c8_57, %c2_58] : memref<16x12xf32, #tpu.memory_space<vmem>>, vector<8x8xf32>
    %169 = vector.extract_strided_slice %63 {offsets = [0, 20], sizes = [8, 1], strides = [1, 1]} : vector<8x24xf32> to vector<8x1xf32>
    %170 = vector.broadcast %169 : vector<8x1xf32> to vector<8x8xf32>
    %171 = arith.mulf %170, %168 : vector<8x8xf32>
    %172 = arith.addf %167, %171 : vector<8x8xf32>
    %c0_59 = arith.constant 0 : index
    %c3_60 = arith.constant 3 : index
    %173 = vector.load %arg7[%c0_59, %c3_60] : memref<16x12xf32, #tpu.memory_space<vmem>>, vector<8x8xf32>
    %174 = vector.extract_strided_slice %63 {offsets = [0, 21], sizes = [8, 1], strides = [1, 1]} : vector<8x24xf32> to vector<8x1xf32>
    %175 = vector.broadcast %174 : vector<8x1xf32> to vector<8x8xf32>
    %176 = arith.mulf %175, %173 : vector<8x8xf32>
    %177 = arith.addf %172, %176 : vector<8x8xf32>
    %c8_61 = arith.constant 8 : index
    %c3_62 = arith.constant 3 : index
    %178 = vector.load %arg7[%c8_61, %c3_62] : memref<16x12xf32, #tpu.memory_space<vmem>>, vector<8x8xf32>
    %179 = vector.extract_strided_slice %63 {offsets = [0, 22], sizes = [8, 1], strides = [1, 1]} : vector<8x24xf32> to vector<8x1xf32>
    %180 = vector.broadcast %179 : vector<8x1xf32> to vector<8x8xf32>
    %181 = arith.mulf %180, %178 : vector<8x8xf32>
    %182 = arith.addf %177, %181 : vector<8x8xf32>
    %c0_63 = arith.constant 0 : index
    %c4_64 = arith.constant 4 : index
    %183 = vector.load %arg7[%c0_63, %c4_64] : memref<16x12xf32, #tpu.memory_space<vmem>>, vector<8x8xf32>
    %184 = vector.extract_strided_slice %63 {offsets = [0, 23], sizes = [8, 1], strides = [1, 1]} : vector<8x24xf32> to vector<8x1xf32>
    %185 = vector.broadcast %184 : vector<8x1xf32> to vector<8x8xf32>
    %186 = arith.mulf %185, %183 : vector<8x8xf32>
    %187 = arith.addf %182, %186 : vector<8x8xf32>
    %188 = tpu.concatenate %79, %105, %141, %187 in 0 : vector<8x8xf32>, vector<8x8xf32>, vector<8x8xf32>, vector<8x8xf32> -> vector<32x8xf32>
    %c0_65 = arith.constant 0 : index
    %c0_66 = arith.constant 0 : index
    %c0_67 = arith.constant 0 : index
    %189 = vector.load %arg5[%c0_65, %c0_66, %c0_67] : memref<1x32x8xf32, #tpu.memory_space<vmem>>, vector<1x32x8xf32>
    %190 = vector.shape_cast %189 : vector<1x32x8xf32> to vector<32x8xf32>
    %191 = vector.shape_cast %188 : vector<32x8xf32> to vector<1x32x8xf32>
    tpu.vector_store %arg5[%c0_65, %c0_66, %c0_67], %191 {strides = array<i32>} : memref<1x32x8xf32, #tpu.memory_space<vmem>>, vector<1x32x8xf32>,
    %cst_68 = arith.constant dense<0.000000e+00> : vector<32xf32>
    %192 = vector.multi_reduction <add>, %188, %cst_68 [1] : vector<32x8xf32> to vector<32xf32>
    %193 = vector.shape_cast %192 : vector<32xf32> to vector<32x1xf32>
    %c0_69 = arith.constant 0 : index
    %c0_70 = arith.constant 0 : index
    %c0_71 = arith.constant 0 : index
    %194 = vector.load %arg6[%c0_69, %c0_70, %c0_71] : memref<1x32x2xf32, #tpu.memory_space<vmem>>, vector<1x32x1xf32>
    %195 = vector.shape_cast %194 : vector<1x32x1xf32> to vector<32x1xf32>
    %196 = vector.shape_cast %193 : vector<32x1xf32> to vector<1x32x1xf32>
    tpu.vector_store %arg6[%c0_69, %c0_70, %c0_71], %196 {strides = array<i32>} : memref<1x32x2xf32, #tpu.memory_space<vmem>>, vector<1x32x1xf32>,
    %197 = arith.mulf %188, %188 : vector<32x8xf32>
    %cst_72 = arith.constant dense<0.000000e+00> : vector<32xf32>
    %198 = vector.multi_reduction <add>, %197, %cst_72 [1] : vector<32x8xf32> to vector<32xf32>
    %199 = vector.shape_cast %198 : vector<32xf32> to vector<32x1xf32>
    %c0_73 = arith.constant 0 : index
    %c0_74 = arith.constant 0 : index
    %c1_75 = arith.constant 1 : index
    %200 = vector.load %arg6[%c0_73, %c0_74, %c1_75] : memref<1x32x2xf32, #tpu.memory_space<vmem>>, vector<1x32x1xf32>
    %201 = vector.shape_cast %200 : vector<1x32x1xf32> to vector<32x1xf32>
    %202 = vector.shape_cast %199 : vector<32x1xf32> to vector<1x32x1xf32>
    tpu.vector_store %arg6[%c0_73, %c0_74, %c1_75], %202 {strides = array<i32>} : memref<1x32x2xf32, #tpu.memory_space<vmem>>, vector<1x32x1xf32>,
    return
  }
  func.func @transform_0(%arg0: i32) -> (i32, i32, i32) {
    %c0_i32 = arith.constant 0 : i32
    %c0_i32_0 = arith.constant 0 : i32
    %c0_i32_1 = arith.constant 0 : i32
    return %arg0, %c0_i32, %c0_i32_0 : i32, i32, i32
  }
  func.func @transform_1(%arg0: i32) -> (i32, i32) {
    %c0_i32 = arith.constant 0 : i32
    %c0_i32_0 = arith.constant 0 : i32
    %c0_i32_1 = arith.constant 0 : i32
    return %c0_i32, %c0_i32_0 : i32, i32
  }
  func.func @transform_2(%arg0: i32) -> (i32, i32) {
    %c0_i32 = arith.constant 0 : i32
    %c0_i32_0 = arith.constant 0 : i32
    %c0_i32_1 = arith.constant 0 : i32
    return %c0_i32, %c0_i32_0 : i32, i32
  }
  func.func @transform_3(%arg0: i32) -> (i32, i32) {
    %c0_i32 = arith.constant 0 : i32
    %c0_i32_0 = arith.constant 0 : i32
    %c0_i32_1 = arith.constant 0 : i32
    return %c0_i32, %c0_i32_0 : i32, i32
  }
  func.func @transform_4(%arg0: i32) -> (i32, i32, i32) {
    %c0_i32 = arith.constant 0 : i32
    %c0_i32_0 = arith.constant 0 : i32
    %c0_i32_1 = arith.constant 0 : i32
    return %arg0, %c0_i32, %c0_i32_0 : i32, i32, i32
  }
  func.func @transform_5(%arg0: i32) -> (i32, i32, i32) {
    %c0_i32 = arith.constant 0 : i32
    %c0_i32_0 = arith.constant 0 : i32
    %c0_i32_1 = arith.constant 0 : i32
    return %arg0, %c0_i32, %c0_i32_0 : i32, i32, i32
  }
}

module attributes {stable_mosaic.version = 11 : i64} {
  func.func @_bn_gelu_kernel(%arg0: i32, %arg1: i32, %arg2: memref<1x32x8xf32, #tpu.memory_space<vmem>>, %arg3: memref<32x1xf32, #tpu.memory_space<vmem>>, %arg4: memref<32x1xf32, #tpu.memory_space<vmem>>, %arg5: memref<1x32x8xf32, #tpu.memory_space<vmem>>) attributes {dimension_semantics = [#tpu.dimension_semantics<parallel>, #tpu.dimension_semantics<parallel>], iteration_bounds = array<i64: 2, 1>, scalar_prefetch = 0 : i64, scratch_operands = 0 : i64, tpu.core_type = #tpu.core_type<tc>, window_params = [{transform_indices = @transform_0, window_bounds = array<i64: 1, 32, 8>}, {pipeline_mode = #tpu.pipeline_mode<synchronous>, transform_indices = @transform_1, window_bounds = array<i64: 32, 1>}, {pipeline_mode = #tpu.pipeline_mode<synchronous>, transform_indices = @transform_2, window_bounds = array<i64: 32, 1>}, {transform_indices = @transform_3, window_bounds = array<i64: 1, 32, 8>}]} {
    %c0 = arith.constant 0 : index
    %c0_0 = arith.constant 0 : index
    %c0_1 = arith.constant 0 : index
    %0 = vector.load %arg2[%c0, %c0_0, %c0_1] : memref<1x32x8xf32, #tpu.memory_space<vmem>>, vector<1x32x8xf32>
    %1 = vector.shape_cast %0 : vector<1x32x8xf32> to vector<32x8xf32>
    %c0_2 = arith.constant 0 : index
    %c0_3 = arith.constant 0 : index
    %2 = vector.load %arg3[%c0_2, %c0_3] : memref<32x1xf32, #tpu.memory_space<vmem>>, vector<32x1xf32>
    %3 = vector.broadcast %2 : vector<32x1xf32> to vector<32x8xf32>
    %4 = arith.mulf %1, %3 : vector<32x8xf32>
    %c0_4 = arith.constant 0 : index
    %c0_5 = arith.constant 0 : index
    %5 = vector.load %arg4[%c0_4, %c0_5] : memref<32x1xf32, #tpu.memory_space<vmem>>, vector<32x1xf32>
    %6 = vector.broadcast %5 : vector<32x1xf32> to vector<32x8xf32>
    %7 = arith.addf %4, %6 : vector<32x8xf32>
    %cst = arith.constant 5.000000e-01 : f32
    %8 = vector.broadcast %cst : f32 to vector<32x8xf32>
    %9 = arith.mulf %8, %7 : vector<32x8xf32>
    %cst_6 = arith.constant 0.707106769 : f32
    %10 = vector.broadcast %cst_6 : f32 to vector<32x8xf32>
    %11 = arith.mulf %7, %10 : vector<32x8xf32>
    %cst_7 = arith.constant 0.000000e+00 : f32
    %12 = vector.broadcast %cst_7 : f32 to vector<32x8xf32>
    %13 = arith.cmpf olt, %11, %12 : vector<32x8xf32>
    %cst_8 = arith.constant -1.000000e+00 : f32
    %cst_9 = arith.constant 1.000000e+00 : f32
    %14 = vector.broadcast %cst_8 : f32 to vector<32x8xf32>
    %15 = vector.broadcast %cst_9 : f32 to vector<32x8xf32>
    %16 = arith.select %13, %14, %15 : vector<32x8xi1>, vector<32x8xf32>
    %17 = math.absf %11 : vector<32x8xf32>
    %cst_10 = arith.constant 0.327591091 : f32
    %18 = vector.broadcast %cst_10 : f32 to vector<32x8xf32>
    %19 = arith.mulf %18, %17 : vector<32x8xf32>
    %cst_11 = arith.constant 1.000000e+00 : f32
    %20 = vector.broadcast %cst_11 : f32 to vector<32x8xf32>
    %21 = arith.addf %20, %19 : vector<32x8xf32>
    %cst_12 = arith.constant 1.000000e+00 : f32
    %22 = vector.broadcast %cst_12 : f32 to vector<32x8xf32>
    %23 = arith.divf %22, %21 : vector<32x8xf32>
    %cst_13 = arith.constant 1.06140542 : f32
    %24 = vector.broadcast %cst_13 : f32 to vector<32x8xf32>
    %25 = arith.mulf %24, %23 : vector<32x8xf32>
    %cst_14 = arith.constant -1.45315206 : f32
    %26 = vector.broadcast %cst_14 : f32 to vector<32x8xf32>
    %27 = arith.addf %25, %26 : vector<32x8xf32>
    %28 = arith.mulf %27, %23 : vector<32x8xf32>
    %cst_15 = arith.constant 1.42141378 : f32
    %29 = vector.broadcast %cst_15 : f32 to vector<32x8xf32>
    %30 = arith.addf %28, %29 : vector<32x8xf32>
    %31 = arith.mulf %30, %23 : vector<32x8xf32>
    %cst_16 = arith.constant -0.284496725 : f32
    %32 = vector.broadcast %cst_16 : f32 to vector<32x8xf32>
    %33 = arith.addf %31, %32 : vector<32x8xf32>
    %34 = arith.mulf %33, %23 : vector<32x8xf32>
    %cst_17 = arith.constant 0.254829586 : f32
    %35 = vector.broadcast %cst_17 : f32 to vector<32x8xf32>
    %36 = arith.addf %34, %35 : vector<32x8xf32>
    %37 = arith.mulf %36, %23 : vector<32x8xf32>
    %cst_18 = arith.constant 0.000000e+00 : f32
    %38 = vector.broadcast %cst_18 : f32 to vector<32x8xf32>
    %39 = arith.subf %38, %17 : vector<32x8xf32>
    %40 = arith.mulf %39, %17 : vector<32x8xf32>
    %41 = math.exp %40 : vector<32x8xf32>
    %42 = arith.mulf %37, %41 : vector<32x8xf32>
    %cst_19 = arith.constant 1.000000e+00 : f32
    %43 = vector.broadcast %cst_19 : f32 to vector<32x8xf32>
    %44 = arith.subf %43, %42 : vector<32x8xf32>
    %45 = arith.mulf %16, %44 : vector<32x8xf32>
    %cst_20 = arith.constant 1.000000e+00 : f32
    %46 = vector.broadcast %cst_20 : f32 to vector<32x8xf32>
    %47 = arith.addf %46, %45 : vector<32x8xf32>
    %48 = arith.mulf %9, %47 : vector<32x8xf32>
    %c0_21 = arith.constant 0 : index
    %c0_22 = arith.constant 0 : index
    %c0_23 = arith.constant 0 : index
    %49 = vector.load %arg5[%c0_21, %c0_22, %c0_23] : memref<1x32x8xf32, #tpu.memory_space<vmem>>, vector<1x32x8xf32>
    %50 = vector.shape_cast %49 : vector<1x32x8xf32> to vector<32x8xf32>
    %51 = vector.shape_cast %48 : vector<32x8xf32> to vector<1x32x8xf32>
    tpu.vector_store %arg5[%c0_21, %c0_22, %c0_23], %51 {strides = array<i32>} : memref<1x32x8xf32, #tpu.memory_space<vmem>>, vector<1x32x8xf32>,
    return
  }
  func.func @transform_0(%arg0: i32, %arg1: i32) -> (i32, i32, i32) {
    %c0_i32 = arith.constant 0 : i32
    %c0_i32_0 = arith.constant 0 : i32
    return %arg0, %c0_i32, %arg1 : i32, i32, i32
  }
  func.func @transform_1(%arg0: i32, %arg1: i32) -> (i32, i32) {
    %c0_i32 = arith.constant 0 : i32
    %c0_i32_0 = arith.constant 0 : i32
    %c0_i32_1 = arith.constant 0 : i32
    return %c0_i32, %c0_i32_0 : i32, i32
  }
  func.func @transform_2(%arg0: i32, %arg1: i32) -> (i32, i32) {
    %c0_i32 = arith.constant 0 : i32
    %c0_i32_0 = arith.constant 0 : i32
    %c0_i32_1 = arith.constant 0 : i32
    return %c0_i32, %c0_i32_0 : i32, i32
  }
  func.func @transform_3(%arg0: i32, %arg1: i32) -> (i32, i32, i32) {
    %c0_i32 = arith.constant 0 : i32
    %c0_i32_0 = arith.constant 0 : i32
    return %arg0, %c0_i32, %arg1 : i32, i32, i32
  }
}

</mosaic_0001>

<bundles_post_ra>
// kernel: embedding_forward.3
= control target key start
LH: loop header
LB: loop body
LE: loop exit
PB: predicated region body
PF: predicated region fallthrough
CT: control target
= control target key end

     0   :  { %s561_s12 = smov 0   ;;  %s563_s13 = smov 0   ;;  %s665_s0 = inlined_call_operand.vmem [shape: f32[2,32,8], index: 0, kind: input, shape index: {}]   ;;  %s666_s1 = inlined_call_operand.vmem [shape: f32[32,1], index: 1, kind: input, shape index: {}]   ;;  %s667_s2 = inlined_call_operand.vmem [shape: f32[32,1], index: 2, kind: input, shape index: {}]   ;;  %s668_s3 = inlined_call_operand.vmem [shape: f32[2,32,8], index: 3, kind: output, shape index: {}]  }
   0x1   :  { %s565_s14 = smov 0  }
   0x2 LB: > { %s25_s15 = sadd.s32 1, %s533_s13  ;;  %p462_p0 = scmp.ge.s32.totalorder %s537_s14, 1  ;;  %s537_s14 = sphi %s565_s14, %s13_s14   ;;  %s533_s13 = sphi %s563_s13, %s670_s13   ;;  %s529_s12 = sphi %s561_s12, %s669_s12  }
   0x3   : > { %p27_p1 = scmp.ge.s32.totalorder %s25_s15, 2  ;;  %p156_p2 = scmp.lt.s32.totalorder %s537_s14, 3 }
   0x5   : > { %s672_s15 = smov (%p27_p1, %s25_s15), 0  ;;  %p157_p3 = pnand %p462_p0, %p156_p2 }
   0x6   : > { %v208_v0 = vld [vmem:[%s666_s1 + $0x10] sm:$0xff] (!%p157_p3)  ;;  %v206_v1 = vld [vmem:[%s666_s1] sm:$0xff] (!%p157_p3)  ;;  %v539_v2 = vmov (!%p157_p3), 0   ;;  %v209_v3 = vld [vmem:[%s666_s1 + $0x18] sm:$0xff] (!%p157_p3)  ;;  %p186_p4 = scmp.lt.s32.totalorder (!%p157_p3), %s529_s12, 1  ;;  %vm370_vm4 = vcmask (!%p157_p3), 64512  }
   0x7   : > { %160 = sbr.rel (%p157_p3) target bundleno = 199 (0xc7), region = 32  ;;  %498 = vset.pattern.permute.xlu1 (!%p157_p3), %v539_v2  ;;  %497 = vset.pattern.permute.xlu0 (!%p157_p3), %v539_v2  ;;  %v207_v4 = vld [vmem:[%s666_s1 + $0x8] sm:$0xff] (!%p157_p3)  ;;  %v234_v6 = vld [vmem:[%s667_s2] sm:$0xff] (!%p157_p3)  ;;  %v237_v7 = vld [vmem:[%s667_s2 + $0x18] sm:$0xff] (!%p157_p3) }
   0x8   : > { %222 = vperm.xlu1 (!%p157_p3), %498, %v208_v0   ;;  %212 = vperm.xlu0 (!%p157_p3), %497, %v206_v1   ;;  %v235_v5 = vld [vmem:[%s667_s2 + $0x8] sm:$0xff] (!%p157_p3)  ;;  %v236_v8 = vld [vmem:[%s667_s2 + $0x10] sm:$0xff] (!%p157_p3) }
   0xc   : > { %227 = vperm.xlu1 (!%p157_p3), %498, %v209_v3   ;;  %217 = vperm.xlu0 (!%p157_p3), %497, %v207_v4  }
   0xe   : > { %s674_s12 = smov (!%p186_p4, %s529_s12), 1 }
   0xf   : > { %s469_s5 = sshll.u32 %s674_s12, 5 }
  0x10   : > { %245 = vperm.xlu1 %498, %v235_v5   ;;  %240 = vperm.xlu0 %497, %v234_v6   ;;  %s193_s8 = scalar_lea.vmem %s665_s0, %s469_s5  ;;  %s201_s11 = scalar_lea.vmem %s668_s3, %s469_s5 }
  0x11   : > { %v202_v11 = vld [vmem:[%s193_s8] sm:$0xff]  ;;  %v203_v14 = vld [vmem:[%s193_s8 + $0x8] sm:$0xff]  ;;  %v204_v19 = vld [vmem:[%s193_s8 + $0x10] sm:$0xff] }
  0x12   : > { %v205_v20 = vld [vmem:[%s193_s8 + $0x18] sm:$0xff] }
  0x14   : > { %255 = vperm.xlu1 %498, %v237_v7   ;;  %250 = vperm.xlu0 %497, %v236_v8  }
  0x87   : > { %v223_v9 = vpop.permute.xlu1 %222  ;;  %v213_v10 = vpop.permute.xlu0 %212 }
  0x88   : > { %v230_v15 = vmul.f32 %v213_v10, %v202_v11  ;;  %v232_v25 = vmul.f32 %v223_v9, %v204_v19 }
  0x8b   : > { %v228_v12 = vpop.permute.xlu1 %227  ;;  %v218_v13 = vpop.permute.xlu0 %217 }
  0x8c   : > { %v231_v16 = vmul.f32 %v218_v13, %v203_v14  ;;  %v233_v26 = vmul.f32 %v228_v12, %v205_v20 }
  0x8f   : > { %v246_v17 = vpop.permute.xlu1 %245  ;;  %v241_v18 = vpop.permute.xlu0 %240 }
  0x90   : > { %v615_v21 = vadd.f32 %v246_v17, %v231_v16  ;;  %v617_v22 = vadd.f32 %v241_v18, %v230_v15 }
  0x92   : > { %v620_v23 = vmul.f32 0.70710677, %v615_v21  ;;  %v623_v24 = vmul.f32 0.70710677, %v617_v22 }
  0x93   : > { %v256_v27 = vpop.permute.xlu1 %255  ;;  %v251_v28 = vpop.permute.xlu0 %250 }
  0x94   : > { %v279_v29 = vand.u32 2147483647, %v620_v23  ;;  %v278_v30 = vand.u32 2147483647, %v623_v24  ;;  %v627_v31 = vadd.f32 %v256_v27, %v233_v26  ;;  %v629_v32 = vadd.f32 %v251_v28, %v232_v25 }
  0x95   : > { %vm271_vm0 = vcmp.lt.f32.partialorder %v620_v23, 0.0  ;;  %vm270_vm1 = vcmp.lt.f32.partialorder %v623_v24, 0.0  ;;  %v263_v24 = vmul.f32 0.5, %v615_v21 }
  0x96   : > { %v283_v33 = vmul.f32 0.3275911, %v279_v29  ;;  %v282_v34 = vmul.f32 0.3275911, %v278_v30  ;;  %v632_v35 = vmul.f32 0.70710677, %v627_v31 }
  0x97   : > { %v635_v36 = vmul.f32 0.70710677, %v629_v32  ;;  %v335_v45 = vsub.f32 0.0, %v279_v29  ;;  %v334_v46 = vsub.f32 0.0, %v278_v30 }
  0x98   : > { %v287_v37 = vadd.f32 1.0, %v283_v33  ;;  %v286_v38 = vadd.f32 1.0, %v282_v34  ;;  %v281_v39 = vand.u32 2147483647, %v632_v35  ;;  %vm273_vm2 = vcmp.lt.f32.partialorder %v632_v35, 0.0 }
  0x99   : > { %v280_v40 = vand.u32 2147483647, %v635_v36  ;;  %v339_v48 = vmul.f32 %v335_v45, %v279_v29  ;;  %v338_v51 = vmul.f32 %v334_v46, %v278_v30  ;;  %vm272_vm3 = vcmp.lt.f32.partialorder %v635_v36, 0.0 }
  0x9a   : > { %499 = vrcp.f32 %v287_v37  ;;  %v285_v41 = vmul.f32 0.3275911, %v281_v39  ;;  %v337_v52 = vsub.f32 0.0, %v281_v39 }
  0x9b   : > { %501 = vrcp.f32 %v286_v38  ;;  %v284_v42 = vmul.f32 0.3275911, %v280_v40  ;;  %v336_v54 = vsub.f32 0.0, %v280_v40  ;;  %v344_v56 = vmul.f32 1.442695, %v339_v48 }
  0x9c   : > { %v289_v43 = vadd.f32 1.0, %v285_v41  ;;  %v342_v60 = vmul.f32 1.442695, %v338_v51  ;;  %v341_v61 = vmul.f32 %v337_v52, %v281_v39 }
  0x9d   : > { %v288_v44 = vadd.f32 1.0, %v284_v42  ;;  %v340_v1 = vmul.f32 %v336_v54, %v280_v40 }
  0x9e   : > { %503 = vrcp.f32 %v289_v43  ;;  %v348_v7 = vmul.f32 1.442695, %v341_v61 }
  0x9f   : > { %505 = vrcp.f32 %v288_v44  ;;  %v346_v11 = vmul.f32 1.442695, %v340_v1  ;;  %v540_v44 = vmov 1.0   ;;  %v264_v1 = vmul.f32 0.5, %v629_v32 }
  0xa0   : > { %507 = vpow2.f32 %v344_v56  ;;  %v275_v45 = vsel %vm271_vm0, -1.0, %v540_v44  ;;  %v262_v56 = vmul.f32 0.5, %v617_v22  ;;  %v276_v21 = vsel %vm272_vm3, -1.0, %v540_v44 }
  0xa1   : > { %509 = vpow2.f32 %v342_v60  ;;  %v277_v60 = vsel %vm273_vm2, -1.0, %v540_v44 }
  0xa2   : > { %511 = vpow2.f32 %v348_v7 }
  0xa3   : > { %513 = vpow2.f32 %v346_v11 }
  0xa4   : > { %v500_v47 = vpop.eup %499 }
  0xa5   : > { %v502_v49 = vpop.eup %501  ;;  %v299_v50 = vmul.f32 1.0614054, %v500_v47 }
  0xa6   : > { %v298_v53 = vmul.f32 1.0614054, %v502_v49 }
  0xa7   : > { %v303_v55 = vadd.f32 -1.4531521, %v299_v50 }
  0xa8   : > { %v302_v57 = vadd.f32 -1.4531521, %v298_v53  ;;  %v504_v58 = vpop.eup %503 }
  0xa9   : > { %v307_v59 = vmul.f32 %v500_v47, %v303_v55  ;;  %v506_v62 = vpop.eup %505  ;;  %v301_v0 = vmul.f32 1.0614054, %v504_v58 }
  0xaa   : > { %v306_v63 = vmul.f32 %v502_v49, %v302_v57  ;;  %v300_v3 = vmul.f32 1.0614054, %v506_v62  ;;  %v508_v30 = vpop.eup %507 }
  0xab   : > { %v311_v2 = vadd.f32 1.4214138, %v307_v59  ;;  %v305_v5 = vadd.f32 -1.4531521, %v301_v0  ;;  %v510_v37 = vpop.eup %509 }
  0xac   : > { %v310_v4 = vadd.f32 1.4214138, %v306_v63  ;;  %v304_v8 = vadd.f32 -1.4531521, %v300_v3  ;;  %v512_v48 = vpop.eup %511  ;;  %v265_v63 = vmul.f32 0.5, %v627_v31 }
  0xad   : > { %v315_v6 = vmul.f32 %v500_v47, %v311_v2  ;;  %v309_v10 = vmul.f32 %v504_v58, %v305_v5  ;;  %v514_v52 = vpop.eup %513 }
  0xae   : > { %v314_v9 = vmul.f32 %v502_v49, %v310_v4  ;;  %v308_v13 = vmul.f32 %v506_v62, %v304_v8 }
  0xaf   : > { %v319_v12 = vadd.f32 -0.28449672, %v315_v6  ;;  %v313_v15 = vadd.f32 1.4214138, %v309_v10 }
  0xb0   : > { %v318_v14 = vadd.f32 -0.28449672, %v314_v9  ;;  %v312_v17 = vadd.f32 1.4214138, %v308_v13 }
  0xb1   : > { %v323_v16 = vmul.f32 %v500_v47, %v319_v12  ;;  %v317_v19 = vmul.f32 %v504_v58, %v313_v15 }
  0xb2   : > { %v322_v18 = vmul.f32 %v502_v49, %v318_v14  ;;  %v316_v25 = vmul.f32 %v506_v62, %v312_v17 }
  0xb3   : > { %v327_v20 = vadd.f32 0.2548296, %v323_v16  ;;  %v321_v27 = vadd.f32 -0.28449672, %v317_v19 }
  0xb4   : > { %v326_v26 = vadd.f32 0.2548296, %v322_v18  ;;  %v320_v29 = vadd.f32 -0.28449672, %v316_v25 }
  0xb5   : > { %v331_v28 = vmul.f32 %v500_v47, %v327_v20  ;;  %v325_v34 = vmul.f32 %v504_v58, %v321_v27 }
  0xb6   : > { %v330_v33 = vmul.f32 %v502_v49, %v326_v26  ;;  %v324_v39 = vmul.f32 %v506_v62, %v320_v29  ;;  %v274_v49 = vsel %vm270_vm1, -1.0, %v540_v44 }
  0xb7   : > { %v351_v38 = vmul.f32 %v508_v30, %v331_v28  ;;  %v329_v41 = vadd.f32 0.2548296, %v325_v34 }
  0xb8   : > { %v350_v40 = vmul.f32 %v510_v37, %v330_v33  ;;  %v328_v43 = vadd.f32 0.2548296, %v324_v39 }
  0xb9   : > { %v355_v42 = vsub.f32 1.0, %v351_v38  ;;  %v333_v47 = vmul.f32 %v504_v58, %v329_v41 }
  0xba   : > { %v354_v46 = vsub.f32 1.0, %v350_v40  ;;  %v332_v51 = vmul.f32 %v506_v62, %v328_v43 }
  0xbb   : > { %v359_v50 = vmul.f32 %v355_v42, %v275_v45  ;;  %v353_v23 = vmul.f32 %v512_v48, %v333_v47 }
  0xbc   : > { %v358_v53 = vmul.f32 %v354_v46, %v274_v49  ;;  %v352_v55 = vmul.f32 %v514_v52, %v332_v51 }
  0xbd   : > { %v363_v54 = vadd.f32 1.0, %v359_v50  ;;  %v357_v58 = vsub.f32 1.0, %v353_v23 }
  0xbe   : > { %v362_v57 = vadd.f32 1.0, %v358_v53  ;;  %v356_v35 = vsub.f32 1.0, %v352_v55 }
  0xbf   : > { %v367_v59 = vmul.f32 %v363_v54, %v263_v24  ;;  %v361_v62 = vmul.f32 %v357_v58, %v277_v60 }
  0xc0   : > { %v366_v61 = vmul.f32 %v362_v57, %v262_v56  ;;  %v360_v36 = vmul.f32 %v356_v35, %v276_v21 }
  0xc1   : > { %372 = vst.msk [vmem:[%s201_s11 + $0x8] sm:$0xff] %vm370_vm4, %v367_v59  ;;  %v365_v0 = vadd.f32 1.0, %v361_v62 }
  0xc2   : > { %371 = vst.msk [vmem:[%s201_s11] sm:$0xff] %vm370_vm4, %v366_v61  ;;  %v364_v2 = vadd.f32 1.0, %v360_v36 }
  0xc3   : > { %v369_v22 = vmul.f32 %v365_v0, %v265_v63 }
  0xc4   : > { %v368_v3 = vmul.f32 %v364_v2, %v264_v1 }
  0xc5   : > { %374 = vst.msk [vmem:[%s201_s11 + $0x18] sm:$0xff] %vm370_vm4, %v369_v22 }
  0xc6   : > { %373 = vst.msk [vmem:[%s201_s11 + $0x10] sm:$0xff] %vm370_vm4, %v368_v3 }
  0xc7 PF: > { %s13_s14 = sadd.s32 1, %s537_s14   ;;  %s669_s12 = smov %s533_s13 }
  0xc8   : > { %p10_p5 = scmp.ge.s32.totalorder %s13_s14, 4   ;;  %s670_s13 = smov %s672_s15 }
  0xca   :  { %12 = sbr.rel (!%p10_p5) target bundleno = 2 (0x2), region = 62 }

// kernel: embedding_forward.2
= control target key start
LH: loop header
LB: loop body
LE: loop exit
PB: predicated region body
PF: predicated region fallthrough
CT: control target
= control target key end

     0   :  { %s866_s18 = smov 0   ;;  %s1004_s0 = inlined_call_operand.vmem [shape: f32[2,8,8], index: 0, kind: input, shape index: {}]   ;;  %s1005_s1 = inlined_call_operand.vmem [shape: f32[8,4], index: 1, kind: input, shape index: {}]   ;;  %s1006_s2 = inlined_call_operand.vmem [shape: f32[8,1], index: 2, kind: input, shape index: {}]   ;;  %s1007_s3 = inlined_call_operand.vmem [shape: f32[8,24], index: 3, kind: input, shape index: {}]   ;;  %s1008_s4 = inlined_call_operand.vmem [shape: f32[2,32,8], index: 4, kind: output, shape index: {0}]   ;;  %s1009_s5 = inlined_call_operand.vmem [shape: f32[2,32,2], index: 5, kind: output, shape index: {1}]  }
   0x1 LB: > { %s715_s19 = sadd.s32 4294967295, %s803_s18   ;;  %p719_p0 = scmp.ge.s32.totalorder %s803_s18, 1  ;;  %s803_s18 = sphi %s866_s18, %s16_s18  }
   0x2   : > { %p189_p1 = scmp.lt.s32.totalorder %s803_s18, 3 }
   0x4   : > { %p190_p2 = pnand %p719_p0, %p189_p1 }
   0x5   : > { %v235_v0 = vld [vmem:[%s1005_s1] sm:$0xff] (!%p190_p2)  ;;  %v805_v1 = vmov (!%p190_p2), 0   ;;  %v806_v2 = vmov (!%p190_p2), 1   ;;  %v807_v4 = vmov (!%p190_p2), 2   ;;  %v808_v6 = vmov (!%p190_p2), 3   ;;  %p221_p3 = scmp.lt.s32.totalorder (!%p190_p2), %s715_s19, 1 }
   0x6   : > { %193 = sbr.rel (%p190_p2) target bundleno = 796 (0x31c), region = 36  ;;  %768 = vset.pattern.permute.xlu0 (!%p190_p2), %v805_v1  ;;  %769 = vset.pattern.permute.xlu1 (!%p190_p2), %v806_v2  ;;  %v236_v3 = vld [vmem:[%s1006_s2] sm:$0xff] (!%p190_p2)  ;;  %v809_v7 = vmov (!%p190_p2), 17   ;;  %v810_v8 = vmov (!%p190_p2), 18   ;;  %v811_v9 = vmov (!%p190_p2), 9   ;;  %v812_v10 = vmov (!%p190_p2), 11  }
   0x7   : > { %246 = vperm.xlu0 (!%p190_p2), %768, %v235_v0   ;;  %262 = vperm.xlu1 (!%p190_p2), %769, %v235_v0   ;;  %v886_v5 = vld [vmem:[%s1007_s3] sm:$0xff] (!%p190_p2)  ;;  %v813_v11 = vmov (!%p190_p2), 10   ;;  %v814_v12 = vmov (!%p190_p2), 21   ;;  %v815_v13 = vmov (!%p190_p2), 19   ;;  %v816_v14 = vmov (!%p190_p2), 20   ;;  %s819_s30 = smov (!%p190_p2), 2  }
   0x8   : > { %v817_v15 = vmov (!%p190_p2), 12   ;;  %vm309_vm0 = vcmask (!%p190_p2), 15360   ;;  %vm312_vm1 = vcmask (!%p190_p2), 97360   ;;  %v818_v16 = vmov (!%p190_p2), 0.0   ;;  %s831_s6 = smov (!%p190_p2), 127   ;;  %s832_s7 = smov (!%p190_p2), 126  }
   0x9   : > { %311 = vst.msk [vmem:[#allocation2 + $0x8] sm:$0xff] (!%p190_p2), %vm309_vm0, %v818_v16  ;;  %310 = vst.msk [vmem:[#allocation2] sm:$0xff] (!%p190_p2), %vm309_vm0, %v818_v16  ;;  %v249_v17 = vlaneseq (!%p190_p2)  ;;  %v820_v54 = vmov (!%p190_p2), 14   ;;  %v821_v55 = vmov (!%p190_p2), 13   ;;  %v822_v56 = vmov (!%p190_p2), 16   ;;  %s833_s8 = smov (!%p190_p2), 125  }
   0xa   : > { %314 = vst.msk [vmem:[#allocation2 + $0x8] sm:$0xff] (!%p190_p2), %vm312_vm1, %v818_v16  ;;  %313 = vst.msk [vmem:[#allocation2] sm:$0xff] (!%p190_p2), %vm312_vm1, %v818_v16  ;;  %v823_v57 = vmov (!%p190_p2), 22   ;;  %v824_v58 = vmov (!%p190_p2), 6   ;;  %v825_v59 = vmov (!%p190_p2), 23   ;;  %v826_v60 = vmov (!%p190_p2), 15  }
   0xb   : > { %241 = vperm.xlu0 (!%p190_p2), %768, %v236_v3   ;;  %770 = vset.pattern.permute.xlu1 (!%p190_p2), %v807_v4  ;;  %v250_v18 = vshrl.u32 (!%p190_p2), %v249_v17, 7  ;;  %v827_v61 = vmov (!%p190_p2), 8   ;;  %v828_v62 = vmov (!%p190_p2), 4   ;;  %v829_v63 = vmov (!%p190_p2), 5   ;;  %s834_s9 = smov (!%p190_p2), 124   ;;  %s835_s10 = smov (!%p190_p2), 1  }
   0xc   : > { %278 = vperm.xlu1 (!%p190_p2), %770, %v235_v0   ;;  %vm319_vm2 = vcmask (!%p190_p2), 80912   ;;  %vm568_vm3 = vcmask (!%p190_p2), 64512   ;;  %vm585_vm4 = vcmask (!%p190_p2), 7168   ;;  %vm622_vm5 = vcmask (!%p190_p2), 15368  }
   0xd   : > { %s1011_s19 = smov (!%p221_p3, %s715_s19), 1  ;;  %v251_v19 = vsub.s32 0, %v250_v18  ;;  %v267_v22 = vsub.s32 1, %v250_v18  ;;  %v283_v23 = vsub.s32 2, %v250_v18  ;;  %v299_v32 = vsub.s32 3, %v250_v18 }
   0xe   : > { %s720_s26 = sshll.u32 %s1011_s19, 3  ;;  %s727_s11 = sshll.u32 %s1011_s19, 5 }
   0xf   : > { %771 = vset.pattern.permute.xlu0 %v808_v6  ;;  %s224_s29 = scalar_lea.vmem %s1004_s0, %s720_s26  ;;  %s229_s14 = scalar_lea.vmem %s1008_s4, %s727_s11 }
  0x10   : > { %294 = vperm.xlu0 %771, %v235_v0   ;;  %772 = vset.pattern.permute.xlu1 %v809_v7  ;;  %v237_v20 = vld [vmem:[%s224_s29] sm:$0xf]  ;;  %v238_v21 = vld [vmem:[%s224_s29 + $0x4] sm:$0xf]  ;;  %v830_v0 = vmov 7   ;;  %s234_s17 = scalar_lea.vmem %s1009_s5, %s727_s11 }
  0x11   : > { %477 = vperm.xlu1 %772, %v886_v5   ;;  %v252_v24 = vrot.slane %v237_v20, %v251_v19  ;;  %v258_v25 = vrot.slane %v238_v21, %v251_v19  ;;  %v268_v28 = vrot.slane %v237_v20, %v267_v22  ;;  %v274_v29 = vrot.slane %v238_v21, %v267_v22 }
  0x12   : > { %v284_v30 = vrot.slane %v237_v20, %v283_v23  ;;  %v290_v31 = vrot.slane %v238_v21, %v283_v23  ;;  %v300_v43 = vrot.slane %v237_v20, %v299_v32  ;;  %v306_v44 = vrot.slane %v238_v21, %v299_v32 }
  0x14   : > { %774 = vset.pattern.permute.xlu0 %v810_v8 }
  0x15   : > { %773 = vset.pattern.permute.xlu1 %v811_v9  ;;  %487 = vperm.xlu0 %774, %v886_v5  }
  0x16   : > { %405 = vperm.xlu1 %773, %v886_v5  }
  0x19   : > { %777 = vset.pattern.permute.xlu0 %v812_v10 }
  0x1a   : > { %775 = vset.pattern.permute.xlu1 %v813_v11  ;;  %425 = vperm.xlu0 %777, %v886_v5  }
  0x1b   : > { %415 = vperm.xlu1 %775, %v886_v5  }
  0x1e   : > { %780 = vset.pattern.permute.xlu0 %v814_v12 }
  0x1f   : > { %776 = vset.pattern.permute.xlu1 %v815_v13 }
  0x20   : > { %497 = vperm.xlu1 %776, %v886_v5  }
  0x24   : > { %778 = vset.pattern.permute.xlu1 %v816_v14 }
  0x25   : > { %507 = vperm.xlu1 %778, %v886_v5  }
  0x29   : > { %779 = vset.pattern.permute.xlu1 %v817_v15 }
  0x86   : > { %v247_v26 = vpop.permute.xlu0 %246  ;;  %v263_v27 = vpop.permute.xlu1 %262 }
  0x87   : > { %v253_v33 = vmul.f32 %v252_v24, %v247_v26  ;;  %v259_v34 = vmul.f32 %v258_v25, %v247_v26  ;;  %v269_v36 = vmul.f32 %v268_v28, %v263_v27  ;;  %v275_v37 = vmul.f32 %v274_v29, %v263_v27 }
  0x8a   : > { %v242_v35 = vpop.permute.xlu0 %241 }
  0x8b   : > { %v254_v38 = vadd.f32 %v253_v33, %v242_v35  ;;  %v260_v39 = vadd.f32 %v259_v34, %v242_v35  ;;  %v279_v40 = vpop.permute.xlu1 %278 }
  0x8c   : > { %v285_v41 = vmul.f32 %v284_v30, %v279_v40  ;;  %v291_v42 = vmul.f32 %v290_v31, %v279_v40 }
  0x8d   : > { %v270_v45 = vadd.f32 %v269_v36, %v254_v38  ;;  %v276_v46 = vadd.f32 %v275_v37, %v260_v39 }
  0x8f   : > { %v286_v47 = vadd.f32 %v285_v41, %v270_v45  ;;  %v292_v48 = vadd.f32 %v291_v42, %v276_v46  ;;  %v295_v49 = vpop.permute.xlu0 %294 }
  0x90   : > { %v301_v50 = vmul.f32 %v300_v43, %v295_v49  ;;  %v307_v51 = vmul.f32 %v306_v44, %v295_v49  ;;  %v478_v3 = vpop.permute.xlu1 %477 }
  0x92   : > { %v302_v52 = vadd.f32 %v301_v50, %v286_v47  ;;  %v308_v53 = vadd.f32 %v307_v51, %v292_v48 }
  0x94   : > { %322 = vrot.lane.b32.xlu0 %v308_v53, %s819_s30  ;;  %316 = vrot.lane.b32.xlu1 %v302_v52, %s819_s30  ;;  %v488_v9 = vpop.permute.xlu0 %487 }
  0x98   : > { %517 = vperm.xlu0 %780, %v886_v5   ;;  %435 = vperm.xlu1 %779, %v886_v5  }
  0x99   : > { %v426_v11 = vpop.permute.xlu0 %425 }
  0x9c   : > { %783 = vset.pattern.permute.xlu0 %v820_v54  ;;  %781 = vset.pattern.permute.xlu1 %v821_v55 }
  0x9d   : > { %455 = vperm.xlu0 %783, %v886_v5   ;;  %445 = vperm.xlu1 %781, %v886_v5  }
  0xa1   : > { %786 = vset.pattern.permute.xlu0 %v822_v56  ;;  %782 = vset.pattern.permute.xlu1 %v823_v57 }
  0xa2   : > { %471 = vperm.xlu0 %786, %v886_v5   ;;  %527 = vperm.xlu1 %782, %v886_v5  }
  0xa6   : > { %790 = vset.pattern.permute.xlu0 %v824_v58  ;;  %784 = vset.pattern.permute.xlu1 %v825_v59 }
  0xa7   : > { %379 = vperm.xlu0 %790, %v886_v5   ;;  %537 = vperm.xlu1 %784, %v886_v5  }
  0xab   : > { %791 = vset.pattern.permute.xlu0 %v807_v4  ;;  %785 = vset.pattern.permute.xlu1 %v826_v60  ;;  %v406_v4 = vpop.permute.xlu1 %405 }
  0xac   : > { %347 = vperm.xlu0 %791, %v886_v5   ;;  %465 = vperm.xlu1 %785, %v886_v5  }
  0xaf   : > { %v416_v7 = vpop.permute.xlu1 %415 }
  0xb0   : > { %787 = vset.pattern.permute.xlu1 %v827_v61  ;;  %794 = vset.pattern.permute.xlu0 %v828_v62 }
  0xb1   : > { %399 = vperm.xlu1 %787, %v886_v5  }
  0xb3   : > { %v498_v8 = vpop.permute.xlu1 %497 }
  0xb5   : > { %788 = vset.pattern.permute.xlu1 %v829_v63 }
  0xb6   : > { %369 = vperm.xlu1 %788, %v886_v5  }
  0xb7   : > { %v508_v10 = vpop.permute.xlu1 %507 }
  0xba   : > { %789 = vset.pattern.permute.xlu1 %v806_v2 }
  0xbb   : > { %337 = vperm.xlu1 %789, %v886_v5  }
  0xbf   : > { %792 = vset.pattern.permute.xlu1 %v830_v0 }
  0xc0   : > { %389 = vperm.xlu1 %792, %v886_v5  }
  0xc4   : > { %793 = vset.pattern.permute.xlu1 %v808_v6 }
 0x106   : > { %v323_v12 = vpop.permute.xlu0 %322  ;;  %v317_v13 = vpop.permute.xlu1 %316 }
 0x107   : > { %325 = vst.msk [vmem:[#allocation2 + $0x8] sm:$0xff] %vm319_vm2, %v323_v12  ;;  %320 = vst.msk [vmem:[#allocation2] sm:$0xff] %vm319_vm2, %v317_v13 }
 0x10e   : > { %v924_v2 = vld [vmem:[#allocation2] sm:$0xff]  ;;  %v928_v16 = vld [vmem:[#allocation2 + $0x8] sm:$0xff] }
 0x10f   : > { %v480_v14 = vmul.f32 %v478_v3, %v924_v2  ;;  %v408_v15 = vmul.f32 %v406_v4, %v924_v2  ;;  %v500_v6 = vmul.f32 %v498_v8, %v924_v2  ;;  %v490_v17 = vmul.f32 %v488_v9, %v928_v16 }
 0x110   : > { %v510_v19 = vmul.f32 %v508_v10, %v928_v16  ;;  %v418_v20 = vmul.f32 %v416_v7, %v928_v16  ;;  %v428_v23 = vmul.f32 %v426_v11, %v924_v2 }
 0x111   : > { %482 = vrot.lane.b32.xlu0 %v480_v14, %s831_s6  ;;  %410 = vrot.lane.b32.xlu1 %v408_v15, %s831_s6 }
 0x115   : > { %502 = vrot.lane.b32.xlu0 %v500_v6, %s832_s7  ;;  %492 = vrot.lane.b32.xlu1 %v490_v17, %s831_s6 }
 0x117   : > { %v436_v18 = vpop.permute.xlu1 %435  ;;  %v518_v21 = vpop.permute.xlu0 %517 }
 0x118   : > { %v520_v22 = vmul.f32 %v518_v21, %v924_v2  ;;  %v438_v25 = vmul.f32 %v436_v18, %v928_v16 }
 0x119   : > { %512 = vrot.lane.b32.xlu0 %v510_v19, %s832_s7  ;;  %420 = vrot.lane.b32.xlu1 %v418_v20, %s831_s6 }
 0x11c   : > { %v446_v24 = vpop.permute.xlu1 %445  ;;  %v456_v28 = vpop.permute.xlu0 %455 }
 0x11d   : > { %522 = vrot.lane.b32.xlu0 %v520_v22, %s833_s8  ;;  %430 = vrot.lane.b32.xlu1 %v428_v23, %s832_s7  ;;  %v448_v29 = vmul.f32 %v446_v24, %v924_v2  ;;  %v458_v31 = vmul.f32 %v456_v28, %v928_v16 }
 0x121   : > { %440 = vrot.lane.b32.xlu1 %v438_v25, %s832_s7  ;;  %v528_v26 = vpop.permute.xlu1 %527  ;;  %v472_v33 = vpop.permute.xlu0 %471 }
 0x122   : > { %v530_v27 = vmul.f32 %v528_v26, %v928_v16  ;;  %v474_v35 = vmul.f32 %v472_v33, %v928_v16 }
 0x124   : > { %532 = vrot.lane.b32.xlu0 %v530_v27, %s833_s8 }
 0x125   : > { %450 = vrot.lane.b32.xlu1 %v448_v29, %s833_s8 }
 0x126   : > { %v538_v30 = vpop.permute.xlu1 %537  ;;  %v380_v40 = vpop.permute.xlu0 %379 }
 0x127   : > { %v540_v32 = vmul.f32 %v538_v30, %v924_v2  ;;  %v382_v42 = vmul.f32 %v380_v40, %v928_v16 }
 0x129   : > { %460 = vrot.lane.b32.xlu1 %v458_v31, %s833_s8  ;;  %542 = vrot.lane.b32.xlu0 %v540_v32, %s834_s9 }
 0x12b   : > { %v466_v34 = vpop.permute.xlu1 %465  ;;  %v348_v45 = vpop.permute.xlu0 %347 }
 0x12c   : > { %v468_v36 = vmul.f32 %v466_v34, %v924_v2 }
 0x12d   : > { %357 = vperm.xlu1 %793, %v886_v5   ;;  %363 = vperm.xlu0 %794, %v886_v5  }
 0x12e   : > { %v475_v37 = vadd.f32 %v474_v35, %v468_v36 }
 0x130   : > { %v400_v38 = vpop.permute.xlu1 %399 }
 0x131   : > { %795 = vset.pattern.permute.xlu1 %v805_v1  ;;  %796 = vset.pattern.permute.xlu0 %v825_v59  ;;  %v350_v1 = vmul.f32 %v348_v45, %v928_v16  ;;  %v402_v56 = vmul.f32 %v400_v38, %v928_v16 }
 0x132   : > { %330 = vperm.xlu1 %795, %v886_v5  }
 0x135   : > { %v370_v39 = vpop.permute.xlu1 %369 }
 0x136   : > { %v372_v41 = vmul.f32 %v370_v39, %v924_v2 }
 0x138   : > { %374 = vrot.lane.b32.xlu1 %v372_v41, %s831_s6 }
 0x13a   : > { %v338_v43 = vpop.permute.xlu1 %337 }
 0x13b   : > { %v340_v44 = vmul.f32 %v338_v43, %v924_v2 }
 0x13c   : > { %384 = vrot.lane.b32.xlu1 %v382_v42, %s831_s6 }
 0x13d   : > { %342 = vrot.lane.b32.xlu0 %v340_v44, %s831_s6 }
 0x13f   : > { %v390_v46 = vpop.permute.xlu1 %389 }
 0x140   : > { %v392_v5 = vmul.f32 %v390_v46, %v924_v2 }
 0x141   : > { %352 = vrot.lane.b32.xlu0 %v350_v1, %s831_s6 }
 0x142   : > { %394 = vrot.lane.b32.xlu1 %v392_v5, %s832_s7 }
 0x183   : > { %v483_v47 = vpop.permute.xlu0 %482  ;;  %v411_v48 = vpop.permute.xlu1 %410 }
 0x184   : > { %v485_v52 = vadd.f32 %v483_v47, %v475_v37  ;;  %v413_v57 = vadd.f32 %v411_v48, %v402_v56 }
 0x187   : > { %v503_v49 = vpop.permute.xlu0 %502  ;;  %v493_v50 = vpop.permute.xlu1 %492 }
 0x188   : > { %v495_v54 = vadd.f32 %v493_v50, %v485_v52 }
 0x18a   : > { %v505_v58 = vadd.f32 %v503_v49, %v495_v54 }
 0x18b   : > { %v421_v51 = vpop.permute.xlu1 %420  ;;  %v513_v53 = vpop.permute.xlu0 %512 }
 0x18c   : > { %v423_v61 = vadd.f32 %v421_v51, %v413_v57  ;;  %v515_v62 = vadd.f32 %v513_v53, %v505_v58 }
 0x18f   : > { %v431_v55 = vpop.permute.xlu1 %430  ;;  %v523_v59 = vpop.permute.xlu0 %522 }
 0x190   : > { %v433_v63 = vadd.f32 %v431_v55, %v423_v61  ;;  %v525_v4 = vadd.f32 %v523_v59, %v515_v62 }
 0x193   : > { %v441_v60 = vpop.permute.xlu1 %440 }
 0x194   : > { %v443_v7 = vadd.f32 %v441_v60, %v433_v63 }
 0x196   : > { %v533_v0 = vpop.permute.xlu0 %532 }
 0x197   : > { %v451_v3 = vpop.permute.xlu1 %450  ;;  %v535_v8 = vadd.f32 %v533_v0, %v525_v4 }
 0x198   : > { %v453_v9 = vadd.f32 %v451_v3, %v443_v7 }
 0x19b   : > { %v543_v10 = vpop.permute.xlu0 %542  ;;  %v461_v11 = vpop.permute.xlu1 %460 }
 0x19c   : > { %v545_v12 = vadd.f32 %v543_v10, %v535_v8  ;;  %v463_v13 = vadd.f32 %v461_v11, %v453_v9 }
 0x19e   : > { %551 = vrot.lane.b32.xlu1 %v545_v12, %s835_s10  ;;  %547 = vrot.lane.b32.xlu0 %v463_v13, %s835_s10 }
 0x1ac   : > { %v364_v14 = vpop.permute.xlu0 %363  ;;  %v358_v15 = vpop.permute.xlu1 %357 }
 0x1ad   : > { %v366_v19 = vmul.f32 %v364_v14, %v928_v16  ;;  %v360_v20 = vmul.f32 %v358_v15, %v924_v2 }
 0x1af   : > { %v367_v25 = vadd.f32 %v366_v19, %v360_v20 }
 0x1b0   : > { %v343_v6 = vpop.permute.xlu0 %342 }
 0x1b1   : > { %v331_v17 = vpop.permute.xlu1 %330 }
 0x1b2   : > { %v333_v18 = vmul.f32 %v331_v17, %v928_v16 }
 0x1b4   : > { %v353_v21 = vpop.permute.xlu0 %352  ;;  %v345_v22 = vadd.f32 %v343_v6, %v333_v18 }
 0x1b5   : > { %v375_v23 = vpop.permute.xlu1 %374 }
 0x1b6   : > { %v355_v24 = vadd.f32 %v353_v21, %v345_v22  ;;  %v377_v28 = vadd.f32 %v375_v23, %v367_v25 }
 0x1b8   : > { %556 = vrot.lane.b32.xlu0 %v355_v24, %s831_s6  ;;  %v590_v27 = vmul.f32 %v355_v24, %v355_v24 }
 0x1b9   : > { %v385_v26 = vpop.permute.xlu1 %384 }
 0x1ba   : > { %v387_v29 = vadd.f32 %v385_v26, %v377_v28 }
 0x1bc   : > { %598 = vrot.lane.b32.xlu0 %v590_v27, %s831_s6 }
 0x1bd   : > { %v395_v30 = vpop.permute.xlu1 %394 }
 0x1be   : > { %v397_v31 = vadd.f32 %v395_v30, %v387_v29 }
 0x1c0   : > { %558 = vrot.lane.b32.xlu1 %v397_v31, %s831_s6  ;;  %v591_v2 = vmul.f32 %v397_v31, %v397_v31 }
 0x1c4   : > { %600 = vrot.lane.b32.xlu1 %v591_v2, %s831_s6 }
 0x210   : > { %v548_v16 = vpop.permute.xlu0 %547  ;;  %v552_v32 = vpop.permute.xlu1 %551 }
 0x211   : > { %560 = vrot.lane.b32.xlu0 %v548_v16, %s831_s6  ;;  %562 = vrot.lane.b32.xlu1 %v552_v32, %s831_s6  ;;  %v592_v33 = vmul.f32 %v548_v16, %v548_v16  ;;  %v593_v34 = vmul.f32 %v552_v32, %v552_v32 }
 0x215   : > { %602 = vrot.lane.b32.xlu0 %v592_v33, %s831_s6  ;;  %604 = vrot.lane.b32.xlu1 %v593_v34, %s831_s6 }
 0x22a   : > { %v557_v35 = vpop.permute.xlu0 %556 }
 0x22b   : > { %569 = vst.msk [vmem:[%s229_s14] sm:$0xff] %vm568_vm3, %v557_v35  ;;  %v573_v37 = vsel %vm568_vm3, %v557_v35, 0.0 }
 0x22e   : > { %v599_v41 = vpop.permute.xlu0 %598 }
 0x22f   : > { %v610_v42 = vsel %vm568_vm3, %v599_v41, 0.0 }
 0x232   : > { %v559_v36 = vpop.permute.xlu1 %558 }
 0x233   : > { %570 = vst.msk [vmem:[%s229_s14 + $0x8] sm:$0xff] %vm568_vm3, %v559_v36  ;;  %v576_v40 = vsel %vm568_vm3, %v559_v36, 0.0 }
 0x234   : > { %574 = vadd.xlane.f32.xlu0 %v573_v37 }
 0x236   : > { %v601_v38 = vpop.permute.xlu1 %600 }
 0x237   : > { %v613_v39 = vsel %vm568_vm3, %v601_v38, 0.0 }
 0x238   : > { %614 = vadd.xlane.f32.xlu0 %v613_v39 }
 0x239   : > { %577 = vadd.xlane.f32.xlu1 %v576_v40 }
 0x23d   : > { %611 = vadd.xlane.f32.xlu1 %v610_v42 }
 0x283   : > { %v561_v43 = vpop.permute.xlu0 %560  ;;  %v563_v44 = vpop.permute.xlu1 %562 }
 0x284   : > { %571 = vst.msk [vmem:[%s229_s14 + $0x10] sm:$0xff] %vm568_vm3, %v561_v43  ;;  %572 = vst.msk [vmem:[%s229_s14 + $0x18] sm:$0xff] %vm568_vm3, %v563_v44  ;;  %v579_v45 = vsel %vm568_vm3, %v561_v43, 0.0  ;;  %v582_v5 = vsel %vm568_vm3, %v563_v44, 0.0 }
 0x285   : > { %580 = vadd.xlane.f32.xlu0 %v579_v45 }
 0x287   : > { %v603_v1 = vpop.permute.xlu0 %602  ;;  %v605_v47 = vpop.permute.xlu1 %604 }
 0x288   : > { %v616_v46 = vsel %vm568_vm3, %v603_v1, 0.0  ;;  %v619_v48 = vsel %vm568_vm3, %v605_v47, 0.0 }
 0x289   : > { %617 = vadd.xlane.f32.xlu1 %v616_v46  ;;  %583 = vadd.xlane.f32.xlu0 %v582_v5 }
 0x28d   : > { %620 = vadd.xlane.f32.xlu0 %v619_v48 }
 0x2c1   : > { %v575_v49 = vpop.xlane.xlu0 %574 }
 0x2c2   : > { %586 = vst.msk [vmem:[%s234_s17] sm:$0xff] %vm585_vm4, %v575_v49 }
 0x2c5   : > { %v615_v51 = vpop.xlane.xlu0 %614 }
 0x2c6   : > { %v578_v50 = vpop.xlane.xlu1 %577 }
 0x2c7   : > { %587 = vst.msk [vmem:[%s234_s17 + $0x8] sm:$0xff] %vm585_vm4, %v578_v50 }
 0x2c8   : > { %624 = vst.msk [vmem:[%s234_s17 + $0x8] sm:$0xff] %vm622_vm5, %v615_v51 }
 0x2ca   : > { %v612_v52 = vpop.xlane.xlu1 %611 }
 0x2cb   : > { %623 = vst.msk [vmem:[%s234_s17] sm:$0xff] %vm622_vm5, %v612_v52 }
 0x312   : > { %v581_v53 = vpop.xlane.xlu0 %580 }
 0x313   : > { %588 = vst.msk [vmem:[%s234_s17 + $0x10] sm:$0xff] %vm585_vm4, %v581_v53 }
 0x316   : > { %v584_v54 = vpop.xlane.xlu0 %583  ;;  %v618_v55 = vpop.xlane.xlu1 %617 }
 0x317   : > { %589 = vst.msk [vmem:[%s234_s17 + $0x18] sm:$0xff] %vm585_vm4, %v584_v54 }
 0x318   : > { %625 = vst.msk [vmem:[%s234_s17 + $0x10] sm:$0xff] %vm622_vm5, %v618_v55 }
 0x31a   : > { %v621_v56 = vpop.xlane.xlu0 %620 }
 0x31b   : > { %626 = vst.msk [vmem:[%s234_s17 + $0x18] sm:$0xff] %vm622_vm5, %v621_v56 }
 0x31c PF: > { %s16_s18 = sadd.s32 1, %s803_s18  }
 0x31d   : > { %p13_p4 = scmp.ge.s32.totalorder %s16_s18, 4  }
 0x31f   :  { %15 = sbr.rel (!%p13_p4) target bundleno = 1 (0x1), region = 78 }

</bundles_post_ra>
